<compile_context>
chip_gen: v7x
topology: tpu7x:2x2x1
jax: 0.10.0
libtpu: 0.0.40
codegen_flags: <defaults>
</compile_context>

<pallas_src>
import math

import jax
import jax.numpy as jnp
from jax.experimental import pallas as pl
from jax.experimental.pallas import tpu as pltpu

# ----------------------------- model config -----------------------------
H = 32            # embedding dim (h)
A = 4             # attention heads (a)
D_K = H // A      # per-head dim
NEG = -1e9        # masked_fill value (matches -1000000000.0)


# ------------------------------- kernel ---------------------------------
def _mha_kernel(x_ref, kv_ref, pad_ref, seq_ref,
                wq_ref, bq_ref, wkv_ref, bkv_ref, wo_ref, bo_ref,
                out_ref):
    """Fused multi-head attention for one batch element (grid axis = batch).

    x_ref:   (1, s_q, H)   query source block
    kv_ref:  (1, s_k, H)   key/value source block (== x block for self-attn)
    pad_ref: (1, 1, s_k)   float, 1.0 where the key is a pad position
    seq_ref: (s_q, s_k)    float, 1.0 where the key is masked (causal mask)
    wq_ref:  (H, H)        Q projection, softmax scale pre-folded
    wkv_ref: (H, 2H)       fused K|V projection
    wo_ref:  (H, H)        output projection
    out_ref: (1, s_q, H)
    """
    h = x_ref.shape[2]

    xq = x_ref[0]          # (s_q, H)
    ykv = kv_ref[0]        # (s_k, H)

    # ---- projections: Q already carries 1/sqrt(d_k); K,V in one matmul ----
    q = jnp.dot(xq, wq_ref[...], preferred_element_type=jnp.float32) + bq_ref[...]
    kv = jnp.dot(ykv, wkv_ref[...], preferred_element_type=jnp.float32) + bkv_ref[...]
    k = kv[:, :h]          # (s_k, H)
    v = kv[:, h:]          # (s_k, H)

    # ---- additive mask bias, built once (no 3-D mask streamed from HBM) ----
    # masked_fill(-1e9) semantics: adding -1e9 to an O(1) score underflows to
    # zero weight after softmax exactly like setting it to -1e9.
    bias = jnp.minimum(pad_ref[0] + seq_ref[...], 1.0) * NEG   # (s_q, s_k)

    # ---- per-head attention (static unroll over 4 heads) ----
    ctx_heads = []
    for hd in range(A):
        lo = hd * D_K
        qh = q[:, lo:lo + D_K]                       # (s_q, d_k)
        kh = k[:, lo:lo + D_K]                       # (s_k, d_k)
        vh = v[:, lo:lo + D_K]                       # (s_k, d_k)

        s = jnp.einsum('qd,kd->qk', qh, kh,
                       preferred_element_type=jnp.float32) + bias
        s = s - jnp.max(s, axis=-1, keepdims=True)
        e = jnp.exp(s)
        p = e * pl.reciprocal(jnp.sum(e, axis=-1, keepdims=True), approx=True)

        ctx_heads.append(jnp.dot(p, vh, preferred_element_type=jnp.float32))

    # ---- single output projection over the concatenated heads ----
    ctx = jnp.concatenate(ctx_heads, axis=-1)        # (s_q, H)
    out = jnp.dot(ctx, wo_ref[...], preferred_element_type=jnp.float32) + bo_ref[...]
    out_ref[0] = out.astype(out_ref.dtype)


# ------------------------------ wrapper ----------------------------------
def pallas_attention(params, x, y=None, padding_mask=None,
                     tgt_sequence_mask=None, attn_type='self'):
    """Mirrors Attention.forward. Masks use True/1.0 == masked position."""
    if attn_type == 'self':
        assert y is None, 'Self Attention but different input for Q K V'
        kv = x
    elif attn_type == 'cross':
        assert y is not None, 'Cross Attention but the same input for Q K V'
        kv = y
    else:
        raise ValueError('Undefined Attention Type')

    B, s_q, h = x.shape
    s_k = kv.shape[1]
    assert h == H

    # PyTorch only applies masking when padding_mask is not None.
    if padding_mask is not None:
        pad = padding_mask.astype(jnp.float32).reshape(B, 1, s_k)
        if tgt_sequence_mask is not None:
            assert attn_type == 'self', 'Sequence mask only for self attention'
            seq = tgt_sequence_mask.astype(jnp.float32)
        else:
            seq = jnp.zeros((s_q, s_k), jnp.float32)
    else:
        pad = jnp.zeros((B, 1, s_k), jnp.float32)
        seq = jnp.zeros((s_q, s_k), jnp.float32)

    wq, bq, wkv, bkv, wo, bo = params

    out = pl.pallas_call(
        _mha_kernel,
        out_shape=jax.ShapeDtypeStruct((B, s_q, H), x.dtype),
        grid_spec=pltpu.PrefetchScalarGridSpec(
            num_scalar_prefetch=0,
            grid=(B,),
            in_specs=[
                pl.BlockSpec((1, s_q, H), lambda b: (b, 0, 0)),   # x
                pl.BlockSpec((1, s_k, H), lambda b: (b, 0, 0)),   # kv
                pl.BlockSpec((1, 1, s_k), lambda b: (b, 0, 0)),   # padding mask
                pl.BlockSpec((s_q, s_k), lambda b: (0, 0)),       # sequence mask
                pl.BlockSpec((H, H), lambda b: (0, 0)),           # Wq (scaled)
                pl.BlockSpec((1, H), lambda b: (0, 0)),           # bq (scaled)
                pl.BlockSpec((H, 2 * H), lambda b: (0, 0)),       # W[k|v]
                pl.BlockSpec((1, 2 * H), lambda b: (0, 0)),       # b[k|v]
                pl.BlockSpec((H, H), lambda b: (0, 0)),           # Wo
                pl.BlockSpec((1, H), lambda b: (0, 0)),           # bo
            ],
            out_specs=pl.BlockSpec((1, s_q, H), lambda b: (b, 0, 0)),
        ),
        compiler_params=pltpu.CompilerParams(
            dimension_semantics=("parallel",),
            vmem_limit_bytes=32 * 1024 * 1024,
        ),
    )(x, kv, pad, seq, wq, bq, wkv, bkv, wo, bo)
    return out


# --------------------------- parameter setup -----------------------------
def _init_linear(key, fan_in, fan_out):
    kw, kb = jax.random.split(key)
    bound = 1.0 / math.sqrt(fan_in)
    w = jax.random.uniform(kw, (fan_in, fan_out), jnp.float32, -bound, bound)
    b = jax.random.uniform(kb, (1, fan_out), jnp.float32, -bound, bound)
    return w, b


def init_attn(key):
    """nn.Linear-style init, then one-time packing for the kernel:
    scale folded into Wq/bq, Wk|Wv fused into a single (H, 2H) slab."""
    ks = jax.random.split(key, 4)
    wq, bq = _init_linear(ks[0], H, H)
    wk, bk = _init_linear(ks[1], H, H)
    wv, bv = _init_linear(ks[2], H, H)
    wo, bo = _init_linear(ks[3], H, H)
    scale = 1.0 / math.sqrt(D_K)
    wq_s, bq_s = wq * scale, bq * scale
    wkv = jnp.concatenate([wk, wv], axis=1)
    bkv = jnp.concatenate([bk, bv], axis=1)
    return (wq_s, bq_s, wkv, bkv, wo, bo)


# --------------------------- pure-JAX reference ---------------------------
def reference_attention(params, x, y=None, padding_mask=None,
                        tgt_sequence_mask=None, attn_type='self'):
    """Direct transcription of the PyTorch forward (exact softmax)."""
    kv = x if attn_type == 'self' else y
    B, s_q, _ = x.shape
    s_k = kv.shape[1]
    wq, bq, wkv, bkv, wo, bo = params
    q = x.reshape(B * s_q, H) @ wq + bq                  # scale already folded
    kvp = kv.reshape(B * s_k, H) @ wkv + bkv
    k, v = kvp[:, :H], kvp[:, H:]
    q = q.reshape(B, s_q, A, D_K).transpose(0, 2, 1, 3)
    k = k.reshape(B, s_k, A, D_K).transpose(0, 2, 1, 3)
    v = v.reshape(B, s_k, A, D_K).transpose(0, 2, 1, 3)
    scores = jnp.einsum('baqd,bakd->baqk', q, k)
    if padding_mask is not None:
        mask = jnp.broadcast_to(padding_mask[:, None, None, :], scores.shape)
        if tgt_sequence_mask is not None:
            mask = jnp.logical_or(mask, tgt_sequence_mask[None, None, :, :])
        scores = jnp.where(mask, NEG, scores)
    w = jax.nn.softmax(scores, axis=-1)
    out = jnp.einsum('baqk,bakd->baqd', w, v)
    out = out.transpose(0, 2, 1, 3).reshape(B, s_q, H)
    return out @ wo + bo


# --------------------------------- main -----------------------------------
if __name__ == "__main__":
    key = jax.random.PRNGKey(0)
    B, TGT_S, SRC_S = 2, 8, 8

    k_x, k_mem, k_self, k_cross = jax.random.split(key, 4)
    x = jax.random.normal(k_x, (B, TGT_S, H), jnp.float32)          # decoder input
    memory = jax.random.normal(k_mem, (B, SRC_S, H), jnp.float32)   # encoder output

    # padding masks: True == pad position (masked out of attention keys)
    tgt_pad = jnp.array([[False] * (TGT_S - 1) + [True],
                         [False] * TGT_S])
    src_pad = jnp.array([[False] * SRC_S,
                         [False] * (SRC_S - 2) + [True] * 2])
    # causal sequence mask: True == future position (masked)
    causal = jnp.triu(jnp.ones((TGT_S, TGT_S), dtype=bool), k=1)

    self_params = init_attn(k_self)
    cross_params = init_attn(k_cross)

    # decoder-style masked self-attention
    out_self = pallas_attention(self_params, x,
                                padding_mask=tgt_pad,
                                tgt_sequence_mask=causal,
                                attn_type='self')
    # cross-attention against the encoder memory (padding mask on source keys)
    out_cross = pallas_attention(cross_params, out_self, y=memory,
                                 padding_mask=src_pad,
                                 attn_type='cross')
    jax.block_until_ready((out_self, out_cross))

    # correctness checks vs. the pure-JAX reference (approx reciprocal in the
    # kernel softmax => loose-ish tolerance, not bitwise)
    ref_self = reference_attention(self_params, x,
                                   padding_mask=tgt_pad,
                                   tgt_sequence_mask=causal, attn_type='self')
    ref_cross = reference_attention(cross_params, out_self, y=memory,
                                    padding_mask=src_pad, attn_type='cross')

    assert out_self.shape == (B, TGT_S, H)
    assert out_cross.shape == (B, TGT_S, H)
    assert bool(jnp.all(jnp.isfinite(out_self)))
    assert bool(jnp.all(jnp.isfinite(out_cross)))
    assert bool(jnp.allclose(out_self, ref_self, atol=3e-2, rtol=3e-2))
    assert bool(jnp.allclose(out_cross, ref_cross, atol=3e-2, rtol=3e-2))
    print("KERNEL_OK")
</pallas_src>

<mosaic_0001>
module attributes {stable_mosaic.version = 11 : i64} {
  func.func @_mha_kernel(%arg0: i32, %arg1: memref<1x8x32xf32, #tpu.memory_space<vmem>>, %arg2: memref<1x8x32xf32, #tpu.memory_space<vmem>>, %arg3: memref<1x1x8xf32, #tpu.memory_space<vmem>>, %arg4: memref<8x8xf32, #tpu.memory_space<vmem>>, %arg5: memref<32x32xf32, #tpu.memory_space<vmem>>, %arg6: memref<1x32xf32, #tpu.memory_space<vmem>>, %arg7: memref<32x64xf32, #tpu.memory_space<vmem>>, %arg8: memref<1x64xf32, #tpu.memory_space<vmem>>, %arg9: memref<32x32xf32, #tpu.memory_space<vmem>>, %arg10: memref<1x32xf32, #tpu.memory_space<vmem>>, %arg11: memref<1x8x32xf32, #tpu.memory_space<vmem>>) attributes {dimension_semantics = [#tpu.dimension_semantics<parallel>], iteration_bounds = array<i64: 2>, scalar_prefetch = 0 : i64, scratch_operands = 0 : i64, tpu.core_type = #tpu.core_type<tc>, window_params = [{transform_indices = @transform_0, window_bounds = array<i64: 1, 8, 32>}, {transform_indices = @transform_1, window_bounds = array<i64: 1, 8, 32>}, {transform_indices = @transform_2, window_bounds = array<i64: 1, 1, 8>}, {pipeline_mode = #tpu.pipeline_mode<synchronous>, transform_indices = @transform_3, window_bounds = array<i64: 8, 8>}, {pipeline_mode = #tpu.pipeline_mode<synchronous>, transform_indices = @transform_4, window_bounds = array<i64: 32, 32>}, {pipeline_mode = #tpu.pipeline_mode<synchronous>, transform_indices = @transform_5, window_bounds = array<i64: 1, 32>}, {pipeline_mode = #tpu.pipeline_mode<synchronous>, transform_indices = @transform_6, window_bounds = array<i64: 32, 64>}, {pipeline_mode = #tpu.pipeline_mode<synchronous>, transform_indices = @transform_7, window_bounds = array<i64: 1, 64>}, {pipeline_mode = #tpu.pipeline_mode<synchronous>, transform_indices = @transform_8, window_bounds = array<i64: 32, 32>}, {pipeline_mode = #tpu.pipeline_mode<synchronous>, transform_indices = @transform_9, window_bounds = array<i64: 1, 32>}, {transform_indices = @transform_10, window_bounds = array<i64: 1, 8, 32>}]} {
    %c0 = arith.constant 0 : index
    %c0_0 = arith.constant 0 : index
    %c0_1 = arith.constant 0 : index
    %0 = vector.load %arg1[%c0, %c0_0, %c0_1] : memref<1x8x32xf32, #tpu.memory_space<vmem>>, vector<1x8x32xf32>
    %1 = vector.shape_cast %0 : vector<1x8x32xf32> to vector<8x32xf32>
    %c0_2 = arith.constant 0 : index
    %c0_3 = arith.constant 0 : index
    %c0_4 = arith.constant 0 : index
    %2 = vector.load %arg2[%c0_2, %c0_3, %c0_4] : memref<1x8x32xf32, #tpu.memory_space<vmem>>, vector<1x8x32xf32>
    %3 = vector.shape_cast %2 : vector<1x8x32xf32> to vector<8x32xf32>
    %c0_5 = arith.constant 0 : index
    %c0_6 = arith.constant 0 : index
    %4 = vector.load %arg5[%c0_5, %c0_6] : memref<32x32xf32, #tpu.memory_space<vmem>>, vector<32x32xf32>
    %cst = arith.constant dense<0.000000e+00> : vector<8x32xf32>
    %5 = tpu.matmul %1, %4, %cst {dimension_numbers = #tpu.dot_dimension_numbers<[1], [0], [0], [1], [0, 0, 1, 1], [], []>} : vector<8x32xf32>, vector<32x32xf32>, vector<8x32xf32> -> vector<8x32xf32>
    %c0_7 = arith.constant 0 : index
    %c0_8 = arith.constant 0 : index
    %6 = vector.load %arg6[%c0_7, %c0_8] : memref<1x32xf32, #tpu.memory_space<vmem>>, vector<1x32xf32>
    %7 = vector.broadcast %6 : vector<1x32xf32> to vector<8x32xf32>
    %8 = arith.addf %5, %7 : vector<8x32xf32>
    %c0_9 = arith.constant 0 : index
    %c0_10 = arith.constant 0 : index
    %9 = vector.load %arg7[%c0_9, %c0_10] : memref<32x64xf32, #tpu.memory_space<vmem>>, vector<32x64xf32>
    %cst_11 = arith.constant dense<0.000000e+00> : vector<8x64xf32>
    %10 = tpu.matmul %3, %9, %cst_11 {dimension_numbers = #tpu.dot_dimension_numbers<[1], [0], [0], [1], [0, 0, 1, 1], [], []>} : vector<8x32xf32>, vector<32x64xf32>, vector<8x64xf32> -> vector<8x64xf32>
    %c0_12 = arith.constant 0 : index
    %c0_13 = arith.constant 0 : index
    %11 = vector.load %arg8[%c0_12, %c0_13] : memref<1x64xf32, #tpu.memory_space<vmem>>, vector<1x64xf32>
    %12 = vector.broadcast %11 : vector<1x64xf32> to vector<8x64xf32>
    %13 = arith.addf %10, %12 : vector<8x64xf32>
    %14 = vector.extract_strided_slice %13 {offsets = [0, 0], sizes = [8, 32], strides = [1, 1]} : vector<8x64xf32> to vector<8x32xf32>
    %15 = vector.extract_strided_slice %13 {offsets = [0, 32], sizes = [8, 32], strides = [1, 1]} : vector<8x64xf32> to vector<8x32xf32>
    %c0_14 = arith.constant 0 : index
    %c0_15 = arith.constant 0 : index
    %c0_16 = arith.constant 0 : index
    %16 = vector.load %arg3[%c0_14, %c0_15, %c0_16] : memref<1x1x8xf32, #tpu.memory_space<vmem>>, vector<1x1x8xf32>
    %17 = vector.shape_cast %16 : vector<1x1x8xf32> to vector<1x8xf32>
    %c0_17 = arith.constant 0 : index
    %c0_18 = arith.constant 0 : index
    %18 = vector.load %arg4[%c0_17, %c0_18] : memref<8x8xf32, #tpu.memory_space<vmem>>, vector<8x8xf32>
    %19 = vector.broadcast %17 : vector<1x8xf32> to vector<8x8xf32>
    %20 = arith.addf %19, %18 : vector<8x8xf32>
    %cst_19 = arith.constant 1.000000e+00 : f32
    %21 = vector.broadcast %cst_19 : f32 to vector<8x8xf32>
    %22 = arith.minimumf %20, %21 : vector<8x8xf32>
    %cst_20 = arith.constant -1.000000e+09 : f32
    %23 = vector.broadcast %cst_20 : f32 to vector<8x8xf32>
    %24 = arith.mulf %22, %23 : vector<8x8xf32>
    %25 = vector.extract_strided_slice %8 {offsets = [0, 0], sizes = [8, 8], strides = [1, 1]} : vector<8x32xf32> to vector<8x8xf32>
    %26 = vector.extract_strided_slice %14 {offsets = [0, 0], sizes = [8, 8], strides = [1, 1]} : vector<8x32xf32> to vector<8x8xf32>
    %27 = vector.extract_strided_slice %15 {offsets = [0, 0], sizes = [8, 8], strides = [1, 1]} : vector<8x32xf32> to vector<8x8xf32>
    "tpu.trace_start"() <{level = 10 : i32, message = "qd,kd->qk"}> : () -> ()
    %cst_21 = arith.constant dense<0.000000e+00> : vector<8x8xf32>
    %28 = tpu.matmul %25, %26, %cst_21 {dimension_numbers = #tpu.dot_dimension_numbers<[1], [1], [0], [0], [0, 0, 1, 0], [], []>} : vector<8x8xf32>, vector<8x8xf32>, vector<8x8xf32> -> vector<8x8xf32>
    "tpu.trace_stop"() : () -> ()
    %29 = arith.addf %28, %24 : vector<8x8xf32>
    %cst_22 = arith.constant dense<0xFF800000> : vector<8xf32>
    %30 = vector.multi_reduction <maximumf>, %29, %cst_22 [1] : vector<8x8xf32> to vector<8xf32>
    %31 = vector.shape_cast %30 : vector<8xf32> to vector<8x1xf32>
    %32 = vector.broadcast %31 : vector<8x1xf32> to vector<8x8xf32>
    %33 = arith.subf %29, %32 : vector<8x8xf32>
    %34 = math.exp %33 : vector<8x8xf32>
    %cst_23 = arith.constant dense<0.000000e+00> : vector<8xf32>
    %35 = vector.multi_reduction <add>, %34, %cst_23 [1] : vector<8x8xf32> to vector<8xf32>
    %36 = vector.shape_cast %35 : vector<8xf32> to vector<8x1xf32>
    %37 = tpu.reciprocal %36 {approx = true} : vector<8x1xf32> -> vector<8x1xf32>
    %38 = vector.broadcast %37 : vector<8x1xf32> to vector<8x8xf32>
    %39 = arith.mulf %34, %38 : vector<8x8xf32>
    %cst_24 = arith.constant dense<0.000000e+00> : vector<8x8xf32>
    %40 = tpu.matmul %39, %27, %cst_24 {dimension_numbers = #tpu.dot_dimension_numbers<[1], [0], [0], [1], [0, 0, 1, 1], [], []>} : vector<8x8xf32>, vector<8x8xf32>, vector<8x8xf32> -> vector<8x8xf32>
    %41 = vector.extract_strided_slice %8 {offsets = [0, 8], sizes = [8, 8], strides = [1, 1]} : vector<8x32xf32> to vector<8x8xf32>
    %42 = vector.extract_strided_slice %14 {offsets = [0, 8], sizes = [8, 8], strides = [1, 1]} : vector<8x32xf32> to vector<8x8xf32>
    %43 = vector.extract_strided_slice %15 {offsets = [0, 8], sizes = [8, 8], strides = [1, 1]} : vector<8x32xf32> to vector<8x8xf32>
    "tpu.trace_start"() <{level = 10 : i32, message = "qd,kd->qk"}> : () -> ()
    %cst_25 = arith.constant dense<0.000000e+00> : vector<8x8xf32>
    %44 = tpu.matmul %41, %42, %cst_25 {dimension_numbers = #tpu.dot_dimension_numbers<[1], [1], [0], [0], [0, 0, 1, 0], [], []>} : vector<8x8xf32>, vector<8x8xf32>, vector<8x8xf32> -> vector<8x8xf32>
    "tpu.trace_stop"() : () -> ()
    %45 = arith.addf %44, %24 : vector<8x8xf32>
    %cst_26 = arith.constant dense<0xFF800000> : vector<8xf32>
    %46 = vector.multi_reduction <maximumf>, %45, %cst_26 [1] : vector<8x8xf32> to vector<8xf32>
    %47 = vector.shape_cast %46 : vector<8xf32> to vector<8x1xf32>
    %48 = vector.broadcast %47 : vector<8x1xf32> to vector<8x8xf32>
    %49 = arith.subf %45, %48 : vector<8x8xf32>
    %50 = math.exp %49 : vector<8x8xf32>
    %cst_27 = arith.constant dense<0.000000e+00> : vector<8xf32>
    %51 = vector.multi_reduction <add>, %50, %cst_27 [1] : vector<8x8xf32> to vector<8xf32>
    %52 = vector.shape_cast %51 : vector<8xf32> to vector<8x1xf32>
    %53 = tpu.reciprocal %52 {approx = true} : vector<8x1xf32> -> vector<8x1xf32>
    %54 = vector.broadcast %53 : vector<8x1xf32> to vector<8x8xf32>
    %55 = arith.mulf %50, %54 : vector<8x8xf32>
    %cst_28 = arith.constant dense<0.000000e+00> : vector<8x8xf32>
    %56 = tpu.matmul %55, %43, %cst_28 {dimension_numbers = #tpu.dot_dimension_numbers<[1], [0], [0], [1], [0, 0, 1, 1], [], []>} : vector<8x8xf32>, vector<8x8xf32>, vector<8x8xf32> -> vector<8x8xf32>
    %57 = vector.extract_strided_slice %8 {offsets = [0, 16], sizes = [8, 8], strides = [1, 1]} : vector<8x32xf32> to vector<8x8xf32>
    %58 = vector.extract_strided_slice %14 {offsets = [0, 16], sizes = [8, 8], strides = [1, 1]} : vector<8x32xf32> to vector<8x8xf32>
    %59 = vector.extract_strided_slice %15 {offsets = [0, 16], sizes = [8, 8], strides = [1, 1]} : vector<8x32xf32> to vector<8x8xf32>
    "tpu.trace_start"() <{level = 10 : i32, message = "qd,kd->qk"}> : () -> ()
    %cst_29 = arith.constant dense<0.000000e+00> : vector<8x8xf32>
    %60 = tpu.matmul %57, %58, %cst_29 {dimension_numbers = #tpu.dot_dimension_numbers<[1], [1], [0], [0], [0, 0, 1, 0], [], []>} : vector<8x8xf32>, vector<8x8xf32>, vector<8x8xf32> -> vector<8x8xf32>
    "tpu.trace_stop"() : () -> ()
    %61 = arith.addf %60, %24 : vector<8x8xf32>
    %cst_30 = arith.constant dense<0xFF800000> : vector<8xf32>
    %62 = vector.multi_reduction <maximumf>, %61, %cst_30 [1] : vector<8x8xf32> to vector<8xf32>
    %63 = vector.shape_cast %62 : vector<8xf32> to vector<8x1xf32>
    %64 = vector.broadcast %63 : vector<8x1xf32> to vector<8x8xf32>
    %65 = arith.subf %61, %64 : vector<8x8xf32>
    %66 = math.exp %65 : vector<8x8xf32>
    %cst_31 = arith.constant dense<0.000000e+00> : vector<8xf32>
    %67 = vector.multi_reduction <add>, %66, %cst_31 [1] : vector<8x8xf32> to vector<8xf32>
    %68 = vector.shape_cast %67 : vector<8xf32> to vector<8x1xf32>
    %69 = tpu.reciprocal %68 {approx = true} : vector<8x1xf32> -> vector<8x1xf32>
    %70 = vector.broadcast %69 : vector<8x1xf32> to vector<8x8xf32>
    %71 = arith.mulf %66, %70 : vector<8x8xf32>
    %cst_32 = arith.constant dense<0.000000e+00> : vector<8x8xf32>
    %72 = tpu.matmul %71, %59, %cst_32 {dimension_numbers = #tpu.dot_dimension_numbers<[1], [0], [0], [1], [0, 0, 1, 1], [], []>} : vector<8x8xf32>, vector<8x8xf32>, vector<8x8xf32> -> vector<8x8xf32>
    %73 = vector.extract_strided_slice %8 {offsets = [0, 24], sizes = [8, 8], strides = [1, 1]} : vector<8x32xf32> to vector<8x8xf32>
    %74 = vector.extract_strided_slice %14 {offsets = [0, 24], sizes = [8, 8], strides = [1, 1]} : vector<8x32xf32> to vector<8x8xf32>
    %75 = vector.extract_strided_slice %15 {offsets = [0, 24], sizes = [8, 8], strides = [1, 1]} : vector<8x32xf32> to vector<8x8xf32>
    "tpu.trace_start"() <{level = 10 : i32, message = "qd,kd->qk"}> : () -> ()
    %cst_33 = arith.constant dense<0.000000e+00> : vector<8x8xf32>
    %76 = tpu.matmul %73, %74, %cst_33 {dimension_numbers = #tpu.dot_dimension_numbers<[1], [1], [0], [0], [0, 0, 1, 0], [], []>} : vector<8x8xf32>, vector<8x8xf32>, vector<8x8xf32> -> vector<8x8xf32>
    "tpu.trace_stop"() : () -> ()
    %77 = arith.addf %76, %24 : vector<8x8xf32>
    %cst_34 = arith.constant dense<0xFF800000> : vector<8xf32>
    %78 = vector.multi_reduction <maximumf>, %77, %cst_34 [1] : vector<8x8xf32> to vector<8xf32>
    %79 = vector.shape_cast %78 : vector<8xf32> to vector<8x1xf32>
    %80 = vector.broadcast %79 : vector<8x1xf32> to vector<8x8xf32>
    %81 = arith.subf %77, %80 : vector<8x8xf32>
    %82 = math.exp %81 : vector<8x8xf32>
    %cst_35 = arith.constant dense<0.000000e+00> : vector<8xf32>
    %83 = vector.multi_reduction <add>, %82, %cst_35 [1] : vector<8x8xf32> to vector<8xf32>
    %84 = vector.shape_cast %83 : vector<8xf32> to vector<8x1xf32>
    %85 = tpu.reciprocal %84 {approx = true} : vector<8x1xf32> -> vector<8x1xf32>
    %86 = vector.broadcast %85 : vector<8x1xf32> to vector<8x8xf32>
    %87 = arith.mulf %82, %86 : vector<8x8xf32>
    %cst_36 = arith.constant dense<0.000000e+00> : vector<8x8xf32>
    %88 = tpu.matmul %87, %75, %cst_36 {dimension_numbers = #tpu.dot_dimension_numbers<[1], [0], [0], [1], [0, 0, 1, 1], [], []>} : vector<8x8xf32>, vector<8x8xf32>, vector<8x8xf32> -> vector<8x8xf32>
    %89 = tpu.concatenate %40, %56, %72, %88 in 1 : vector<8x8xf32>, vector<8x8xf32>, vector<8x8xf32>, vector<8x8xf32> -> vector<8x32xf32>
    %c0_37 = arith.constant 0 : index
    %c0_38 = arith.constant 0 : index
    %90 = vector.load %arg9[%c0_37, %c0_38] : memref<32x32xf32, #tpu.memory_space<vmem>>, vector<32x32xf32>
    %cst_39 = arith.constant dense<0.000000e+00> : vector<8x32xf32>
    %91 = tpu.matmul %89, %90, %cst_39 {dimension_numbers = #tpu.dot_dimension_numbers<[1], [0], [0], [1], [0, 0, 1, 1], [], []>} : vector<8x32xf32>, vector<32x32xf32>, vector<8x32xf32> -> vector<8x32xf32>
    %c0_40 = arith.constant 0 : index
    %c0_41 = arith.constant 0 : index
    %92 = vector.load %arg10[%c0_40, %c0_41] : memref<1x32xf32, #tpu.memory_space<vmem>>, vector<1x32xf32>
    %93 = vector.broadcast %92 : vector<1x32xf32> to vector<8x32xf32>
    %94 = arith.addf %91, %93 : vector<8x32xf32>
    %c0_42 = arith.constant 0 : index
    %c0_43 = arith.constant 0 : index
    %c0_44 = arith.constant 0 : index
    %95 = vector.load %arg11[%c0_42, %c0_43, %c0_44] : memref<1x8x32xf32, #tpu.memory_space<vmem>>, vector<1x8x32xf32>
    %96 = vector.shape_cast %95 : vector<1x8x32xf32> to vector<8x32xf32>
    %97 = vector.shape_cast %94 : vector<8x32xf32> to vector<1x8x32xf32>
    tpu.vector_store %arg11[%c0_42, %c0_43, %c0_44], %97 {strides = array<i32>} : memref<1x8x32xf32, #tpu.memory_space<vmem>>, vector<1x8x32xf32>,
    return
  }
  func.func @transform_0(%arg0: i32) -> (i32, i32, i32) {
    %c0_i32 = arith.constant 0 : i32
    %c0_i32_0 = arith.constant 0 : i32
    %c0_i32_1 = arith.constant 0 : i32
    return %arg0, %c0_i32, %c0_i32_0 : i32, i32, i32
  }
  func.func @transform_1(%arg0: i32) -> (i32, i32, i32) {
    %c0_i32 = arith.constant 0 : i32
    %c0_i32_0 = arith.constant 0 : i32
    %c0_i32_1 = arith.constant 0 : i32
    return %arg0, %c0_i32, %c0_i32_0 : i32, i32, i32
  }
  func.func @transform_2(%arg0: i32) -> (i32, i32, i32) {
    %c0_i32 = arith.constant 0 : i32
    %c0_i32_0 = arith.constant 0 : i32
    %c0_i32_1 = arith.constant 0 : i32
    return %arg0, %c0_i32, %c0_i32_0 : i32, i32, i32
  }
  func.func @transform_3(%arg0: i32) -> (i32, i32) {
    %c0_i32 = arith.constant 0 : i32
    %c0_i32_0 = arith.constant 0 : i32
    %c0_i32_1 = arith.constant 0 : i32
    return %c0_i32, %c0_i32_0 : i32, i32
  }
  func.func @transform_4(%arg0: i32) -> (i32, i32) {
    %c0_i32 = arith.constant 0 : i32
    %c0_i32_0 = arith.constant 0 : i32
    %c0_i32_1 = arith.constant 0 : i32
    return %c0_i32, %c0_i32_0 : i32, i32
  }
  func.func @transform_5(%arg0: i32) -> (i32, i32) {
    %c0_i32 = arith.constant 0 : i32
    %c0_i32_0 = arith.constant 0 : i32
    %c0_i32_1 = arith.constant 0 : i32
    return %c0_i32, %c0_i32_0 : i32, i32
  }
  func.func @transform_6(%arg0: i32) -> (i32, i32) {
    %c0_i32 = arith.constant 0 : i32
    %c0_i32_0 = arith.constant 0 : i32
    %c0_i32_1 = arith.constant 0 : i32
    return %c0_i32, %c0_i32_0 : i32, i32
  }
  func.func @transform_7(%arg0: i32) -> (i32, i32) {
    %c0_i32 = arith.constant 0 : i32
    %c0_i32_0 = arith.constant 0 : i32
    %c0_i32_1 = arith.constant 0 : i32
    return %c0_i32, %c0_i32_0 : i32, i32
  }
  func.func @transform_8(%arg0: i32) -> (i32, i32) {
    %c0_i32 = arith.constant 0 : i32
    %c0_i32_0 = arith.constant 0 : i32
    %c0_i32_1 = arith.constant 0 : i32
    return %c0_i32, %c0_i32_0 : i32, i32
  }
  func.func @transform_9(%arg0: i32) -> (i32, i32) {
    %c0_i32 = arith.constant 0 : i32
    %c0_i32_0 = arith.constant 0 : i32
    %c0_i32_1 = arith.constant 0 : i32
    return %c0_i32, %c0_i32_0 : i32, i32
  }
  func.func @transform_10(%arg0: i32) -> (i32, i32, i32) {
    %c0_i32 = arith.constant 0 : i32
    %c0_i32_0 = arith.constant 0 : i32
    %c0_i32_1 = arith.constant 0 : i32
    return %arg0, %c0_i32, %c0_i32_0 : i32, i32, i32
  }
}

</mosaic_0001>

<bundles_post_ra>
// kernel: tpu_custom_call.1
= control target key start
LH: loop header
LB: loop body
LE: loop exit
PB: predicated region body
PF: predicated region fallthrough
CT: control target
= control target key end

     0   :  { %s2525_s0 = inlined_call_operand.hbm [shape: f32[2,8,32], index: 0, kind: input, shape index: {}]   ;;  %s2526_s1 = inlined_call_operand.hbm [shape: f32[2,8,32], index: 1, kind: input, shape index: {}]   ;;  %s2527_s2 = inlined_call_operand.vmem [shape: f32[2,1,8], index: 2, kind: input, shape index: {}]   ;;  %s2528_s3 = inlined_call_operand.vmem [shape: f32[8,8], index: 3, kind: input, shape index: {}]   ;;  %s2529_s4 = inlined_call_operand.hbm [shape: f32[32,32], index: 4, kind: input, shape index: {}]   ;;  %s2530_s5 = inlined_call_operand.vmem [shape: f32[1,32], index: 5, kind: input, shape index: {}]   ;;  %s2531_s6 = inlined_call_operand.hbm [shape: f32[32,64], index: 6, kind: input, shape index: {}]   ;;  %s2532_s7 = inlined_call_operand.vmem [shape: f32[1,64], index: 7, kind: input, shape index: {}]   ;;  %s2533_s8 = inlined_call_operand.hbm [shape: f32[32,32], index: 8, kind: input, shape index: {}]   ;;  %s2534_s9 = inlined_call_operand.vmem [shape: f32[1,32], index: 9, kind: input, shape index: {}]   ;;  %s2535_s10 = inlined_call_operand.hbm [shape: f32[2,8,32], index: 10, kind: output, shape index: {}]  }
   0x1   :  { %2543 = sst [smem:[#allocation19_spill]] %s2529_s4 }
   0x2   :  { %2544 = sst [smem:[#allocation20_spill]] %s2531_s6 }
   0x3   :  { %2545 = sst [smem:[#allocation21_spill]] %s2533_s8 }
   0x4   :  { %2546 = sst [smem:[#allocation22_spill]] %s2534_s9 }
   0x5   :  { %2547 = sst [smem:[#allocation23_spill]] %s2535_s10 }
   0x6   :  { %15 = vsyncpa [#allocation3], 0 }
   0x7   :  { %17 = vsyncpa [#allocation3 + $0x1], 0 }
   0x8   :  { %18 = vsyncpa [#allocation6], 0 }
   0x9   :  { %20 = vsyncpa [#allocation6 + $0x1], 0 }
   0xa   :  { %21 = vsyncpa [#allocation9], 0 }
   0xb   :  { %22 = vsyncpa [#allocation4], 0 }
   0xc   :  { %24 = vsyncpa [#allocation4 + $0x1], 0  ;;  %s2131_s13 = smov 0   ;;  %s2133_s14 = smov 0  }
   0xd   :  { %s2135_s15 = smov 0   ;;  %s2137_s16 = smov 0  }
   0xe LB: > { %2548 = sst [smem:[#allocation17_spill]] %s2041_s13  ;;  %s2152_s17 = sadd.s32 4294967295, %s2053_s16   ;;  %s2053_s16 = sphi %s2137_s16, %s2578_s16   ;;  %s2049_s15 = sphi %s2135_s15, %s2577_s15   ;;  %s2045_s14 = sphi %s2133_s14, %s2576_s14   ;;  %s2041_s13 = sphi %s2131_s13, %s2575_s13  }
   0xf   : > { %s1556_s18 = sadd.s32 4294967294, %s2053_s16   ;;  %p50_p0 = scmp.ne.s32.totalorder %s2045_s14, %s2041_s13 }
  0x10   : > { %p2536_p1 = scmp.eq.s32.totalorder %s2152_s17, 0  ;;  %p279_p3 = scmp.eq.s32.totalorder %s1556_s18, 1 }
  0x11   : > { %p1557_p5 = scmp.ge.s32.totalorder %s2053_s16, 1  ;;  %p286_p7 = scmp.lt.s32.totalorder %s2053_s16, 3 }
  0x12   : > { %p2161_p4 = por %p2536_p1, %p50_p0  ;;  %p2166_p6 = por %p279_p3, %p50_p0 }
  0x13   : > { %p2171_p8 = pnand %p1557_p5, %p286_p7  ;;  %s2055_s22 = smov [#allocation7]  }
  0x14   : > { %s2549_s19 = scalar_select %p2161_p4, 1, 0 }
  0x15   : > { %s2550_s20 = scalar_select %p2166_p6, 1, 0 }
  0x16   : > { %s2552_s21 = scalar_select %p2171_p8, 1, 0 }
  0x17   : > { %2551 = sst [smem:[#allocation18_spill]] %s2550_s20  ;;  %s301_s23 = sshll.u32 %s2055_s22, 4  ;;  %s2175_s23 = int_to_ptr.vmem [resolvable:$true] %s301_s23 }
  0x18   : > { %p1736_p9 = pneg %p2171_p8  ;;  %s2056_s25 = smov [#allocation8]  }
  0x19   : > { %s317_s26 = sshll.u32 %s2056_s25, 4  ;;  %s2057_s27 = smov [#allocation10]   ;;  %s2186_s26 = int_to_ptr.vmem [resolvable:$true] %s317_s26 }
  0x1a   : > { %p2182_p11 = pnand %p1736_p9, %p2536_p1  ;;  %s2188_s28 = sshll.u32 %s2057_s27, 4  ;;  %s334_s28 = int_to_ptr.vmem [resolvable:$true] %s2188_s28 }
  0x1b   : > { %s2554_s4 = sld [smem:[#allocation19_spill]] }
  0x1c   : > { %p2198_p13 = pneg %p2182_p11 }
  0x21   : > { %s1831_s11 = scalar_lea.hbm %s2554_s4, 512 }
  0x22   : > { %p1832_p12 = scmp.ne.s32.totalorder %s2554_s4, %s1831_s11  ;;  %p1838_p5 = scmp.lt.u32.totalorder %s1831_s11, %s2554_s4 }
  0x24   : > { %p1834_p0 = pnand %p2198_p13, %p1832_p12 }
  0x26   : > { %p1835_p3 = pneg %p1834_p0 }
  0x28   : > { %p1840_p7 = pnand %p1838_p5, %p1835_p3 }
  0x2a   : > { %1843 = shalt.err (!%p1840_p7)
}
  0x2b   : > { %s1844_s29 = scalar_lea.vmem %s2175_s23, 512  ;;  %p1852_p2 = scmp.lt.s32.totalorder %s2175_s23, %s2175_s23 }
  0x2c   : > { %p1845_p9 = scmp.ne.s32.totalorder %s2175_s23, %s1844_s29  ;;  %p1853_p6 = scmp.lt.s32.totalorder %s1844_s29, %s1844_s29 }
  0x2e   : > { %p1847_p10 = pnand %p1845_p9, %p2198_p13  ;;  %p1854_p12 = por %p1853_p6, %p1852_p2 }
  0x30   : > { %p1848_p1 = pneg %p1847_p10 }
  0x32   : > { %p1855_p0 = pnand %p1854_p12, %p1848_p1 }
  0x34   : > { %1858 = shalt.err (!%p1855_p0)
}
  0x35   : > { %s2058_s30 = smov 128   ;;  %s2059_s11 = smov 8  }
  0x36   : > { %1739 = dma.hbm_to_vmem [thread:$0]  (!%p2182_p11), %s2554_s4, 512, %s2175_s23, [#allocation6], %s2058_s30, %s2058_s30, %s2059_s11  }
  0x37   : > { %s2556_s6 = sld [smem:[#allocation20_spill]] }
  0x3d   : > { %s1859_s29 = scalar_lea.hbm %s2556_s6, 512 }
  0x3e   : > { %p1860_p1 = scmp.ne.s32.totalorder %s2556_s6, %s1859_s29  ;;  %p1866_p10 = scmp.lt.u32.totalorder %s1859_s29, %s2556_s6 }
  0x40   : > { %p1862_p2 = pnand %p1860_p1, %p2198_p13 }
  0x42   : > { %p1863_p6 = pneg %p1862_p2 }
  0x44   : > { %p1868_p3 = pnand %p1866_p10, %p1863_p6 }
  0x46   : > { %1871 = shalt.err (!%p1868_p3)
}
  0x47   : > { %s1872_s23 = scalar_lea.vmem %s2186_s26, 512  ;;  %p1880_p12 = scmp.lt.s32.totalorder %s2186_s26, %s2186_s26 }
  0x48   : > { %p1873_p5 = scmp.ne.s32.totalorder %s2186_s26, %s1872_s23  ;;  %p1881_p0 = scmp.lt.s32.totalorder %s1872_s23, %s1872_s23 }
  0x4a   : > { %p1875_p7 = pnand %p1873_p5, %p2198_p13  ;;  %p1882_p1 = por %p1881_p0, %p1880_p12 }
  0x4c   : > { %p1876_p9 = pneg %p1875_p7 }
  0x4e   : > { %p1883_p2 = pnand %p1882_p1, %p1876_p9 }
  0x50   : > { %1886 = shalt.err (!%p1883_p2)
}
  0x51   : > { %1742 = dma.hbm_to_vmem [thread:$0]  (!%p2182_p11), %s2556_s6, 512, %s2186_s26, [#allocation9], %s2058_s30, %s2058_s30, %s2059_s11  }
  0x52   : > { %s2557_s8 = sld [smem:[#allocation21_spill]] }
  0x58   : > { %s1887_s12 = scalar_lea.hbm %s2557_s8, 512 }
  0x59   : > { %p1888_p6 = scmp.ne.s32.totalorder %s2557_s8, %s1887_s12  ;;  %p1894_p5 = scmp.lt.u32.totalorder %s1887_s12, %s2557_s8 }
  0x5b   : > { %p1890_p10 = pnand %p1888_p6, %p2198_p13 }
  0x5d   : > { %p1891_p3 = pneg %p1890_p10 }
  0x5f   : > { %p1896_p7 = pnand %p1894_p5, %p1891_p3 }
  0x61   : > { %1899 = shalt.err (!%p1896_p7)
}
  0x62   : > { %s1900_s23 = scalar_lea.vmem %s334_s28, 512  ;;  %p1908_p1 = scmp.lt.s32.totalorder %s334_s28, %s334_s28 }
  0x63   : > { %p1901_p9 = scmp.ne.s32.totalorder %s334_s28, %s1900_s23  ;;  %p1909_p2 = scmp.lt.s32.totalorder %s1900_s23, %s1900_s23 }
  0x65   : > { %p1903_p12 = pnand %p1901_p9, %p2198_p13  ;;  %p1910_p4 = por %p1909_p2, %p1908_p1 }
  0x67   : > { %p1904_p0 = pneg %p1903_p12 }
  0x69   : > { %p1911_p8 = pnand %p1910_p4, %p1904_p0 }
  0x6b   : > { %1914 = shalt.err (!%p1911_p8)
}
  0x6c   : > { %1745 = dma.hbm_to_vmem [thread:$0]  (!%p2182_p11), %s2557_s8, 512, %s334_s28, [#allocation9], %s2058_s30, %s2058_s30, %s2059_s11  }
  0x6d   : > { %s2271_s22 = sadd.s32 1, %s2053_s16   ;;  %s37_s10 = sadd.s32 1, %s2049_s15 }
  0x6e   : > { %s34_s24 = ssub.s32 %s2053_s16, %s2271_s22  ;;  %p44_p8 = scmp.ne.s32.totalorder %s2049_s15, %s2045_s14 }
  0x6f   : > { %p35_p4 = scmp.eq.s32.totalorder %s34_s24, 0  ;;  %p45_p13 = scmp.eq.s32.totalorder %s2053_s16, 0 }
  0x70   : > { %p1760_p6 = scmp.lt.s32.totalorder %s2053_s16, 2  ;;  %p2558_p3 = scmp.eq.s32.totalorder %s2152_s17, 1 }
  0x71   : > { %s2281_s13 = scalar_select %p35_p4, %s2049_s15, %s37_s10  }
  0x72   : > { %p46_p10 = por %p45_p13, %p44_p8  ;;  %p2285_p5 = por %p2558_p3, %p44_p8 }
  0x73   : > { %s350_s12 = sand.u32 1, %s2049_s15   ;;  %s1563_s18 = sshll.u32 %s2053_s16, 7 }
  0x74   : > { %s2559_s20 = scalar_select %p2285_p5, 1, 0 }
  0x75   : > { %s2291_s28 = sshll.u32 %s350_s12, 3  ;;  %s2296_s25 = scalar_lea.hbm %s2525_s0, %s1563_s18 }
  0x76   : > { %s354_s27 = scalar_lea.vmem [#allocation2], %s2291_s28  ;;  %p2299_p11 = pnand %p1760_p6, %p46_p10 }
  0x77   : > { %s361_s29 = sshll.u32 %s354_s27, 4  ;;  %s2308_s24 = scalar_lea.hbm %s2526_s1, %s1563_s18  ;;  %s2303_s29 = int_to_ptr.vmem [resolvable:$true] %s361_s29 }
  0x78   : > { %s351_s10 = scalar_lea.sflag [#allocation3], %s350_s12  ;;  %s1915_s30 = scalar_lea.hbm %s2296_s25, 128 }
  0x79   : > { %p1916_p7 = scmp.ne.s32.totalorder %s2296_s25, %s1915_s30  ;;  %p1917_p9 = pneg %p2299_p11 }
  0x7a   : > { %s1920_s4 = scalar_lea.hbm %s2525_s0, 256  ;;  %p1921_p1 = scmp.lt.u32.totalorder %s2296_s25, %s2525_s0 }
  0x7b   : > { %p1918_p12 = pnand %p1917_p9, %p1916_p7  ;;  %p1922_p2 = scmp.lt.u32.totalorder %s1920_s4, %s1915_s30 }
  0x7c   : > { %p1924_p8 = scmp.lt.u32.totalorder %s1915_s30, %s2296_s25 }
  0x7d   : > { %p1919_p0 = pneg %p1918_p12  ;;  %p1923_p4 = por %p1922_p2, %p1921_p1 }
  0x7f   : > { %p1925_p13 = por %p1924_p8, %p1923_p4 }
  0x81   : > { %p1926_p6 = pnand %p1925_p13, %p1919_p0 }
  0x83   : > { %1929 = shalt.err (!%p1926_p6)
}
  0x84   : > { %s1930_s12 = scalar_lea.vmem %s2303_s29, 128  ;;  %s2060_s18 = smov [#allocation2]  }
  0x85   : > { %p1931_p10 = scmp.ne.s32.totalorder %s2303_s29, %s1930_s12  ;;  %s1935_s26 = sshll.u32 %s2060_s18, 4  ;;  %s1936_s26 = int_to_ptr.vmem [resolvable:$false] %s1935_s26 }
  0x86   : > { %s1937_s6 = scalar_lea.vmem %s1936_s26, 256  ;;  %p1938_p12 = scmp.lt.s32.totalorder %s2303_s29, %s1936_s26 }
  0x87   : > { %p1933_p3 = pnand %p1931_p10, %p1917_p9  ;;  %p1939_p1 = scmp.lt.s32.totalorder %s1937_s6, %s1930_s12 }
  0x89   : > { %p1934_p7 = pneg %p1933_p3  ;;  %p1940_p2 = por %p1939_p1, %p1938_p12 }
  0x8b   : > { %p1941_p4 = pnand %p1940_p2, %p1934_p7 }
  0x8d   : > { %1944 = shalt.err (!%p1941_p4)
}
  0x8e   : > { %1749 = dma.hbm_to_vmem [thread:$0]  (!%p2299_p11), %s2296_s25, 128, %s2303_s29, %s351_s10  }
  0x8f   : > { %s368_s4 = sand.u32 1, %s2053_s16   ;;  %s372_s8 = scalar_lea.vmem [#allocation5], %s2291_s28 }
  0x90   : > { %s379_s9 = sshll.u32 %s372_s8, 4  ;;  %s369_s30 = scalar_lea.sflag [#allocation6], %s368_s4  ;;  %s380_s9 = int_to_ptr.vmem [resolvable:$true] %s379_s9 }
  0x91   : > { %s1945_s11 = scalar_lea.hbm %s2308_s24, 128  ;;  %s1950_s18 = scalar_lea.hbm %s2526_s1, 256 }
  0x92   : > { %p1946_p0 = scmp.ne.s32.totalorder %s2308_s24, %s1945_s11  ;;  %p1951_p6 = scmp.lt.u32.totalorder %s2308_s24, %s2526_s1 }
  0x93   : > { %p1952_p10 = scmp.lt.u32.totalorder %s1950_s18, %s1945_s11  ;;  %p1954_p7 = scmp.lt.u32.totalorder %s1945_s11, %s2308_s24 }
  0x94   : > { %p1948_p8 = pnand %p1946_p0, %p1917_p9 }
  0x95   : > { %p1953_p3 = por %p1952_p10, %p1951_p6 }
  0x96   : > { %p1949_p13 = pneg %p1948_p8 }
  0x97   : > { %p1955_p12 = por %p1954_p7, %p1953_p3 }
  0x99   : > { %p1956_p1 = pnand %p1955_p12, %p1949_p13 }
  0x9b   : > { %1959 = shalt.err (!%p1956_p1)
}
  0x9c   : > { %s1960_s28 = scalar_lea.vmem %s380_s9, 128  ;;  %s2061_s25 = smov [#allocation5]  }
  0x9d   : > { %p1961_p2 = scmp.ne.s32.totalorder %s380_s9, %s1960_s28  ;;  %s1965_s29 = sshll.u32 %s2061_s25, 4  ;;  %s1966_s29 = int_to_ptr.vmem [resolvable:$false] %s1965_s29 }
  0x9e   : > { %s1967_s10 = scalar_lea.vmem %s1966_s29, 256  ;;  %p1968_p8 = scmp.lt.s32.totalorder %s380_s9, %s1966_s29 }
  0x9f   : > { %p1963_p4 = pnand %p1961_p2, %p1917_p9  ;;  %p1969_p5 = scmp.lt.s32.totalorder %s1967_s10, %s1960_s28 }
  0xa1   : > { %p1964_p0 = pneg %p1963_p4  ;;  %p1970_p6 = por %p1969_p5, %p1968_p8 }
  0xa3   : > { %p1971_p10 = pnand %p1970_p6, %p1964_p0 }
  0xa5   : > { %1974 = shalt.err (!%p1971_p10)
}
  0xa6   : > { %1752 = dma.hbm_to_vmem [thread:$0]  (!%p2299_p11), %s2308_s24, 128, %s380_s9, %s369_s30  }
  0xa7   : > { %p2561_p13 = scmp.ne.s32.totalorder %s2552_s21, 0 }
  0xa8   : > { %s2359_s4 = sand.u32 (!%p2561_p13), 1, %s2045_s14   ;;  %p2562_p5 = scmp.ne.s32.totalorder (!%p2561_p13), %s2549_s19, 0 }
  0xa9   : > { %394 = sbr.rel (%p2561_p13) target bundleno = 1623 (0x657), region = 60  ;;  %s2362_s8 = sshll.u32 (!%p2561_p13), %s2359_s4, 3 }
  0xaa   : > { %s397_s11 = scalar_lea.sflag (!%p2561_p13), [#allocation3], %s2359_s4  ;;  %s400_s27 = scalar_lea.vmem (!%p2561_p13), [#allocation2], %s2362_s8 }
  0xb0   : > { %2020 = dma.done.wait (%p2562_p5), %s397_s11, 128  }
  0xb1   : > { %2022 = vsyncadd (%p2562_p5), %s397_s11, 4294967168  ;;  %s405_s21 = sand.u32 1, %s2152_s17   ;;  %s409_s24 = scalar_lea.vmem [#allocation5], %s2362_s8 }
  0xb2   : > { %s406_s23 = scalar_lea.sflag [#allocation6], %s405_s21 }
  0xb3   : > { %2024 = dma.done.wait (%p2562_p5), %s406_s23, 128  }
  0xb4   : > { %2026 = vsyncadd (%p2562_p5), %s406_s23, 4294967168  ;;  %p2563_p11 = scmp.eq.s32.totalorder %s2152_s17, 0 }
  0xb6   : > { %2028 = dma.done.wait (%p2563_p11), [#allocation6], 512   ;;  %p2564_p9 = pmov %p2563_p11 }
  0xb8   : > { %2030 = vsyncadd (%p2564_p9), [#allocation6], 4294966784  ;;  %p2565_p3 = pmov %p2564_p9 }
  0xba   : > { %2032 = dma.done.wait (%p2565_p3), [#allocation9], 1024   ;;  %p2566_p7 = pmov %p2565_p3 }
  0xbb   : > { %v2062_v0 = vmov 0.0|0.0   ;;  %vm2063_vm0 = vmmov 0   ;;  %v2064_v1 = vmov 0.0   ;;  %v556_v2 = vld [vmem:[#allocation8] sm:$0xff]  ;;  %v557_v3 = vld [vmem:[#allocation8 + $0x8] sm:$0xff]  ;;  %v558_v7 = vld [vmem:[#allocation8 + $0x10] sm:$0xff] }
  0xbc   : > { %2034 = vsyncadd (%p2566_p7), [#allocation9], 4294966272  ;;  %1706 = vmatprep.subr.bf16.mxu1 %v2062_v0  ;;  %1700 = vmatprep.subr.bf16.mxu0 %v2062_v0  ;;  %v471_v4 = vld [vmem:[#allocation7] sm:$0xff]  ;;  %v1707_v5 = vpack.c.bf16 %v557_v3, %v556_v2  ;;  %v472_v6 = vld [vmem:[#allocation7 + $0x8] sm:$0xff]  ;;  %vm482_vm1 = vcmask 261120   ;;  %vm651_vm2 = vcmask 64512  }
  0xbd   : > { %1646 = vmatprep.mubr.msk.f32.mxu1 %vm2063_vm0, %v2064_v1  ;;  %1635 = vmatprep.mubr.msk.f32.mxu0 %vm2063_vm0, %v2064_v1  ;;  %v559_v8 = vld [vmem:[#allocation8 + $0x18] sm:$0xff]  ;;  %v1701_v9 = vpack.c.bf16 %v472_v6, %v471_v4  ;;  %v473_v10 = vld [vmem:[#allocation7 + $0x10] sm:$0xff]  ;;  %v469_v15 = vld [vmem:[%s400_s27] sm:$0xff]  ;;  %s2065_s18 = smov 112   ;;  %s2066_s26 = smov 120   ;;  %vm1323_vm3 = vcmask 130048  }
  0xbe   : > { %v474_v11 = vld [vmem:[#allocation7 + $0x18] sm:$0xff]  ;;  %1708 = vmatpush3.bf16.msra.mxu1 %v1707_v5  ;;  %v1710_v12 = vpack.c.bf16 %v559_v8, %v558_v7  ;;  %v1575_v16 = vld [vmem:[%s2532_s7] ss:$0 sm:$0xff]  ;;  %s2067_s6 = smov 104   ;;  %p466_p12 = scmp.lt.s32.totalorder %s2152_s17, 1  ;;  %vm1325_vm4 = vcmask 195584  }
  0xbf   : > { %1702 = vmatpush3.bf16.msra.mxu0 %v1701_v9  ;;  %1709 = vmatprep.subr.bf16.mxu1 %v2062_v0  ;;  %v1704_v13 = vpack.c.bf16 %v474_v11, %v473_v10  ;;  %v470_v14 = vld [vmem:[%s409_s24] sm:$0xff]  ;;  %v1573_v18 = vld [vmem:[%s2530_s5] ss:$0 sm:$0xff]  ;;  %s2068_s21 = smov 96   ;;  %s2069_s23 = smov 80  }
  0xc0   : > { %1703 = vmatprep.subr.bf16.mxu0 %v2062_v0  ;;  %s467_s28 = scalar_select %p466_p12, %s2152_s17, 1  ;;  %v641_v31 = vld [vmem:[%s2528_s3] sm:$0xff] }
  0xc1   : > { %s2070_s24 = smov 72   ;;  %s2071_s19 = smov 88  }
  0xc2   : > { %1711 = vmatpush3.bf16.msra.mxu1 %v1710_v12  ;;  %s468_s10 = scalar_lea.vmem %s2527_s2, %s467_s28  ;;  %s2072_s9 = smov 8  }
  0xc3   : > { %1705 = vmatpush3.bf16.msra.mxu0 %v1704_v13  ;;  %1649 = vmatprep.subr.mxu1 %v2064_v1  ;;  %v1577_v30 = vld [vmem:[%s468_s10] ss:$0 sm:$0xff]  ;;  %s2073_s30 = smov 16   ;;  %s2074_s12 = smov 24  }
  0xc4   : > { %1659 = vmatprep.subr.mxu0 %v2064_v1  ;;  %v648_v32 = vadd.f32 %v1577_v30, %v641_v31  ;;  %v1329_v30 = vld [vmem:[#allocation10 + $0x10] sm:$0xff]  ;;  %v1330_v31 = vld [vmem:[#allocation10 + $0x18] sm:$0xff]  ;;  %s1593_s28 = sshll.u32 %s2152_s17, 7  ;;  %s465_s25 = scalar_lea.vmem [#allocation11], %s2362_s8 }
  0xc5   : > { %1647 = vmatmul.mubr.msk.f32.vlgmr.msra.gmra.mrb[0].mxu1 %vm482_vm1, %v470_v14  ;;  %s1426_s29 = sshll.u32 %s465_s25, 4  ;;  %s2568_s27 = sld [smem:[#allocation23_spill]]  ;;  %s2482_s29 = int_to_ptr.vmem [resolvable:$true] %s1426_s29 }
  0xc6   : > { %1636 = vmatmul.mubr.msk.f32.vlgmr.msra.gmra.mrb[0].mxu0 %vm482_vm1, %v469_v15  ;;  %1651 = vmatprep.mubr.msk.f32.mxu1 %vm2063_vm0, %v2064_v1  ;;  %v649_v33 = vmin.f32 %v648_v32, 1.0  ;;  %v1716_v32 = vpack.c.bf16 %v1330_v31, %v1329_v30  ;;  %p2569_p2 = scmp.ne.s32.totalorder %s2559_s20, 0  ;;  %s2075_s17 = smov [#allocation11]  }
  0xc7   : > { %1661 = vmatprep.mubr.msk.f32.mxu0 %vm2063_vm0, %v2064_v1  ;;  %s1979_s8 = sshll.u32 %s2075_s17, 4  ;;  %s1980_s8 = int_to_ptr.vmem [resolvable:$false] %s1979_s8 }
  0xc8   : > { %v650_v34 = vmul.f32 -1e+09, %v649_v33  ;;  %p1982_p8 = scmp.lt.s32.totalorder %s2482_s29, %s1980_s8 }
 0x198   : > { %v636_v17 = vpop.f32.mrb[0].mxu1 }
 0x199   : > { %v2410_v19 = vadd.f32 %v1575_v16, %v636_v17  ;;  %v1648_v20 = vpop.f32.mrb[1].mxu1  ;;  %v552_v21 = vpop.f32.mrb[0].mxu0 }
 0x19a   : > { %v1637_v22 = vpop.f32.mrb[1].mxu0  ;;  %v553_v23 = vadd.f32 %v1573_v18, %v552_v21 }
 0x19b   : > { %982 = vrot.lane.b32.xlu1 %v2410_v19, %s2065_s18  ;;  %817 = vrot.lane.b32.xlu0 %v2410_v19, %s2066_s26 }
 0x19c   : > { %1650 = vmatpush3.xpose.msk.msra.mxu1 %vm651_vm2, %v2410_v19 }
 0x19d   : > { %1654 = vmatprep.subr.mxu1 %v2064_v1 }
 0x19f   : > { %1652 = vmatmul.mubr.msk.f32.vlgmr.msra.gmra.mrb[2].mxu1 %vm651_vm2, %v553_v23  ;;  %980 = vrot.lane.b32.xlu1 %v553_v23, %s2065_s18 }
 0x1a0   : > { %815 = vrot.lane.b32.xlu0 %v553_v23, %s2066_s26  ;;  %1656 = vmatprep.mubr.msk.f32.mxu1 %vm2063_vm0, %v2064_v1 }
 0x1a3   : > { %1145 = vrot.lane.b32.xlu1 %v553_v23, %s2067_s6 }
 0x1a4   : > { %1147 = vrot.lane.b32.xlu0 %v2410_v19, %s2067_s6  ;;  %s2567_s6 = sld [smem:[#allocation22_spill]] }
 0x20d   : > { %v818_v24 = vpop.permute.xlu0 %817  ;;  %v983_v25 = vpop.permute.xlu1 %982 }
 0x20e   : > { %1660 = vmatpush3.xpose.msk.msra.mxu0 %vm651_vm2, %v818_v24 }
 0x20f   : > { %1669 = vmatprep.subr.mxu0 %v2064_v1 }
 0x211   : > { %v981_v27 = vpop.permute.xlu1 %980 }
 0x212   : > { %v816_v26 = vpop.permute.xlu0 %815 }
 0x213   : > { %1662 = vmatmul.mubr.msk.f32.vlgmr.msra.gmra.mrb[2].mxu0 %vm651_vm2, %v816_v26 }
 0x214   : > { %1670 = vmatpush3.xpose.msk.msra.mxu0 %vm651_vm2, %v983_v25  ;;  %1671 = vmatprep.mubr.msk.f32.mxu0 %vm2063_vm0, %v2064_v1 }
 0x215   : > { %1679 = vmatprep.subr.mxu0 %v2064_v1  ;;  %v1146_v29 = vpop.permute.xlu1 %1145 }
 0x216   : > { %v1148_v28 = vpop.permute.xlu0 %1147 }
 0x217   : > { %1672 = vmatmul.mubr.msk.f32.vlgmr.msra.gmra.mrb[4].mxu0 %vm651_vm2, %v981_v27  ;;  %v1327_v27 = vld [vmem:[#allocation10] sm:$0xff] }
 0x218   : > { %1680 = vmatpush3.xpose.msk.msra.mxu0 %vm651_vm2, %v1148_v28  ;;  %1681 = vmatprep.mubr.msk.f32.mxu0 %vm2063_vm0, %v2064_v1  ;;  %v1328_v28 = vld [vmem:[#allocation10 + $0x8] sm:$0xff] }
 0x219   : > { %1712 = vmatprep.subr.bf16.mxu0 %v2062_v0 }
 0x21b   : > { %1682 = vmatmul.mubr.msk.f32.vlgmr.msra.gmra.mrb[6].mxu0 %vm651_vm2, %v1146_v29  ;;  %v1713_v29 = vpack.c.bf16 %v1328_v28, %v1327_v27 }
 0x21c   : > { %1697 = vmatprep.mubr.msk.f32.mxu0 %vm2063_vm0, %v2064_v1 }
 0x21d   : > { %1714 = vmatpush3.bf16.msra.mxu0 %v1713_v29 }
 0x21e   : > { %1715 = vmatprep.subr.bf16.mxu0 %v2062_v0 }
 0x221   : > { %1717 = vmatpush3.bf16.msra.mxu0 %v1716_v32 }
 0x272   : > { %v724_v35 = vpop.f32.mrb[2].mxu1 }
 0x273   : > { %v725_v36 = vadd.f32 %v724_v35, %v650_v34  ;;  %v1653_v37 = vpop.f32.mrb[3].mxu1 }
 0x275   : > { %v728_v38 = vsel %vm651_vm2, %v725_v36, -inf }
 0x276   : > { %729 = vmax.xlane.f32.xlu0 %v728_v38 }
 0x2e6   : > { %v889_v39 = vpop.f32.mrb[2].mxu0 }
 0x2e7   : > { %v890_v40 = vadd.f32 %v889_v39, %v650_v34  ;;  %v1663_v41 = vpop.f32.mrb[3].mxu0 }
 0x2e9   : > { %v893_v42 = vsel %vm651_vm2, %v890_v40, -inf }
 0x2ea   : > { %894 = vmax.xlane.f32.xlu1 %v893_v42  ;;  %v1054_v43 = vpop.f32.mrb[4].mxu0 }
 0x2eb   : > { %v1055_v44 = vadd.f32 %v1054_v43, %v650_v34  ;;  %v1673_v45 = vpop.f32.mrb[5].mxu0  ;;  %v1590_v43 = vld [vmem:[%s2567_s6] ss:$0 sm:$0xff] }
 0x2ed   : > { %v1058_v46 = vsel %vm651_vm2, %v1055_v44, -inf }
 0x2ee   : > { %1059 = vmax.xlane.f32.xlu0 %v1058_v46  ;;  %v1219_v47 = vpop.f32.mrb[6].mxu0 }
 0x2ef   : > { %v1220_v48 = vadd.f32 %v1219_v47, %v650_v34  ;;  %v1683_v49 = vpop.f32.mrb[7].mxu0 }
 0x2f1   : > { %v1223_v50 = vsel %vm651_vm2, %v1220_v48, -inf }
 0x2f2   : > { %1224 = vmax.xlane.f32.xlu0 %v1223_v50 }
 0x2fb   : > { %739 = vrot.lane.b32.xlu1 %v2410_v19, %s2068_s21  ;;  %s2480_s21 = scalar_lea.hbm %s2568_s27, %s1593_s28 }
 0x303   : > { %v730_v51 = vpop.xlane.xlu0 %729 }
 0x304   : > { %v731_v52 = vsub.f32 %v725_v36, %v730_v51 }
 0x306   : > { %v732_v53 = vmul.f32 1.442695, %v731_v52 }
 0x308   : > { %1815 = vpow2.f32 %v732_v53 }
 0x312   : > { %v1816_v54 = vpop.eup %1815 }
 0x313   : > { %v734_v55 = vsel %vm651_vm2, %v1816_v54, 0.0 }
 0x31f   : > { %735 = vadd.xlane.f32.xlu1 %v734_v55 }
 0x377   : > { %v895_v56 = vpop.xlane.xlu1 %894 }
 0x378   : > { %v896_v57 = vsub.f32 %v890_v40, %v895_v56 }
 0x37a   : > { %v897_v58 = vmul.f32 1.442695, %v896_v57 }
 0x37b   : > { %v740_v59 = vpop.permute.xlu1 %739  ;;  %v1060_v60 = vpop.xlane.xlu0 %1059 }
 0x37c   : > { %1817 = vpow2.f32 %v897_v58  ;;  %v1061_v61 = vsub.f32 %v1055_v44, %v1060_v60  ;;  %1655 = vmatpush3.msra.mxu1 %v740_v59 }
 0x37d   : > { %1664 = vmatprep.subr.mxu1 %v2064_v1 }
 0x37e   : > { %v1062_v62 = vmul.f32 1.442695, %v1061_v61 }
 0x37f   : > { %v1225_v63 = vpop.xlane.xlu0 %1224 }
 0x380   : > { %1819 = vpow2.f32 %v1062_v62  ;;  %v1226_v2 = vsub.f32 %v1220_v48, %v1225_v63 }
 0x382   : > { %v1227_v3 = vmul.f32 1.442695, %v1226_v2 }
 0x384   : > { %1821 = vpow2.f32 %v1227_v3 }
 0x386   : > { %v1818_v4 = vpop.eup %1817 }
 0x387   : > { %v899_v5 = vsel %vm651_vm2, %v1818_v4, 0.0 }
 0x388   : > { %900 = vadd.xlane.f32.xlu0 %v899_v5 }
 0x38a   : > { %v1820_v6 = vpop.eup %1819 }
 0x38b   : > { %v1064_v7 = vsel %vm651_vm2, %v1820_v6, 0.0 }
 0x38c   : > { %1065 = vadd.xlane.f32.xlu1 %v1064_v7 }
 0x38e   : > { %v1822_v8 = vpop.eup %1821 }
 0x38f   : > { %v1229_v9 = vsel %vm651_vm2, %v1822_v8, 0.0 }
 0x390   : > { %1230 = vadd.xlane.f32.xlu0 %v1229_v9 }
 0x39d   : > { %1069 = vrot.lane.b32.xlu1 %v2410_v19, %s2069_s23  ;;  %s1413_s23 = scalar_lea.sflag [#allocation4], %s2359_s4 }
 0x3a1   : > { %1234 = vrot.lane.b32.xlu1 %v2410_v19, %s2070_s24  ;;  %s1975_s24 = scalar_lea.vmem %s2482_s29, 128 }
 0x3a2   : > { %p1976_p1 = scmp.ne.s32.totalorder %s2482_s29, %s1975_s24 }
 0x3a4   : > { %p1977_p4 = pnand %p1976_p1, %p2569_p2 }
 0x3a6   : > { %904 = vrot.lane.b32.xlu0 %v2410_v19, %s2071_s19  ;;  %p1978_p0 = pneg %p1977_p4  ;;  %s1981_s19 = scalar_lea.vmem %s1980_s8, 256 }
 0x3a7   : > { %p1983_p6 = scmp.lt.s32.totalorder %s1981_s19, %s1975_s24 }
 0x3a9   : > { %p1984_p10 = por %p1983_p6, %p1982_p8 }
 0x3ab   : > { %p1985_p13 = pnand %p1984_p10, %p1978_p0 }
 0x3ac   : > { %v736_v10 = vpop.xlane.xlu1 %735 }
 0x3ad   : > { %1823 = vrcp.f32 %v736_v10 }
 0x3b7   : > { %v1824_v11 = vpop.eup %1823 }
 0x3b8   : > { %v738_v12 = vmul.f32 %v1824_v11, %v1816_v54 }
 0x3ba   : > { %1657 = vmatmul.mubr.msk.f32.vlgmr.msra.gmra.mrb[4].mxu1 %vm651_vm2, %v738_v12 }
 0x3bb   : > { %1666 = vmatprep.mubr.msk.f32.mxu1 %vm2063_vm0, %v2064_v1 }
 0x415   : > { %v901_v13 = vpop.xlane.xlu0 %900 }
 0x416   : > { %1825 = vrcp.f32 %v901_v13 }
 0x419   : > { %v1066_v14 = vpop.xlane.xlu1 %1065 }
 0x41a   : > { %1827 = vrcp.f32 %v1066_v14 }
 0x41d   : > { %v1231_v15 = vpop.xlane.xlu0 %1230  ;;  %v1070_v18 = vpop.permute.xlu1 %1069 }
 0x41e   : > { %1829 = vrcp.f32 %v1231_v15 }
 0x420   : > { %v1826_v16 = vpop.eup %1825 }
 0x421   : > { %v903_v17 = vmul.f32 %v1826_v16, %v1818_v4  ;;  %v905_v20 = vpop.permute.xlu0 %904  ;;  %v1235_v22 = vpop.permute.xlu1 %1234 }
 0x422   : > { %1665 = vmatpush3.msra.mxu1 %v905_v20 }
 0x423   : > { %1667 = vmatmul.mubr.msk.f32.vlgmr.msra.gmra.mrb[6].mxu1 %vm651_vm2, %v903_v17  ;;  %1674 = vmatprep.subr.mxu1 %v2064_v1 }
 0x424   : > { %v1828_v19 = vpop.eup %1827  ;;  %1675 = vmatpush3.msra.mxu1 %v1070_v18  ;;  %1676 = vmatprep.mubr.msk.f32.mxu1 %vm2063_vm0, %v2064_v1 }
 0x425   : > { %v1068_v21 = vmul.f32 %v1828_v19, %v1820_v6  ;;  %1684 = vmatprep.subr.mxu1 %v2064_v1 }
 0x427   : > { %1677 = vmatmul.mubr.msk.f32.vlgmr.msra.gmra.mrb[8].mxu1 %vm651_vm2, %v1068_v21 }
 0x428   : > { %v1830_v23 = vpop.eup %1829  ;;  %1685 = vmatpush3.msra.mxu1 %v1235_v22  ;;  %1686 = vmatprep.mubr.msk.f32.mxu1 %vm2063_vm0, %v2064_v1 }
 0x429   : > { %v1233_v24 = vmul.f32 %v1830_v23, %v1822_v8 }
 0x42b   : > { %1687 = vmatmul.mubr.msk.f32.vlgmr.msra.gmra.mrb[10].mxu1 %vm651_vm2, %v1233_v24 }
 0x48d   : > { %v811_v25 = vpop.f32.mrb[4].mxu1 }
 0x48e   : > { %v1658_v26 = vpop.f32.mrb[5].mxu1 }
 0x4f6   : > { %v976_v33 = vpop.f32.mrb[6].mxu1 }
 0x4f7   : > { %1311 = vrot.lane.b32.xlu0 %v976_v33, %s2072_s9  ;;  %v1668_v34 = vpop.f32.mrb[7].mxu1 }
 0x4fa   : > { %v1141_v1 = vpop.f32.mrb[8].mxu1 }
 0x4fb   : > { %1315 = vrot.lane.b32.xlu1 %v1141_v1, %s2073_s30  ;;  %v1678_v35 = vpop.f32.mrb[9].mxu1 }
 0x4fe   : > { %v1306_v36 = vpop.f32.mrb[10].mxu1 }
 0x4ff   : > { %1319 = vrot.lane.b32.xlu0 %v1306_v36, %s2074_s12  ;;  %v1688_v37 = vpop.f32.mrb[11].mxu1 }
 0x569   : > { %v1312_v38 = vpop.permute.xlu0 %1311 }
 0x56a   : > { %v1322_v39 = vsel %vm651_vm2, %v811_v25, %v1312_v38 }
 0x56d   : > { %v1316_v0 = vpop.permute.xlu1 %1315 }
 0x56e   : > { %v1324_v40 = vsel %vm1323_vm3, %v1322_v39, %v1316_v0 }
 0x571   : > { %v1320_v41 = vpop.permute.xlu0 %1319 }
 0x572   : > { %v1326_v42 = vsel %vm1325_vm4, %v1324_v40, %v1320_v41 }
 0x573   : > { %1698 = vmatmul.mubr.msk.f32.vlgmr.msra.gmra.mrb[8].mxu0 %vm482_vm1, %v1326_v42 }
 0x646   : > { %v1407_v44 = vpop.f32.mrb[8].mxu0 }
 0x647   : > { %v1408_v45 = vadd.f32 %v1590_v43, %v1407_v44  ;;  %v1699_v46 = vpop.f32.mrb[9].mxu0 }
 0x649   : > { %1411 = vst.msk [vmem:[%s465_s25] sm:$0xff] %vm482_vm1, %v1408_v45 }
 0x64a   : > { %1988 = shalt.err (!%p1985_p13)
}
 0x64b   : > { %s1989_s4 = scalar_lea.hbm %s2480_s21, 128  ;;  %s1993_s12 = scalar_lea.hbm %s2568_s27, 256 }
 0x64c   : > { %p1990_p5 = scmp.ne.s32.totalorder %s2480_s21, %s1989_s4  ;;  %p1994_p3 = scmp.lt.u32.totalorder %s2480_s21, %s2568_s27 }
 0x64d   : > { %p1995_p7 = scmp.lt.u32.totalorder %s1993_s12, %s1989_s4  ;;  %p1997_p1 = scmp.lt.u32.totalorder %s1989_s4, %s2480_s21 }
 0x64e   : > { %p1991_p11 = pnand %p1990_p5, %p2569_p2 }
 0x64f   : > { %p1996_p12 = por %p1995_p7, %p1994_p3 }
 0x650   : > { %p1992_p9 = pneg %p1991_p11 }
 0x651   : > { %p1998_p4 = por %p1997_p1, %p1996_p12 }
 0x653   : > { %p1999_p0 = pnand %p1998_p4, %p1992_p9 }
 0x655   : > { %2002 = shalt.err (!%p1999_p0)
}
 0x656   : > { %1734 = dma.vmem_to_hbm [thread:$0]  (%p2569_p2), %s2482_s29, 128, %s2480_s21, %s1413_s23  }
 0x657 PF: > { %s2570_s6 = sld [smem:[#allocation17_spill]]  ;;  %s2571_s28 = sld [smem:[#allocation18_spill]] }
 0x658   : > { %p2573_p6 = scmp.ge.s32.totalorder %s2053_s16, 2 }
 0x65d   : > { %s1438_s25 = sand.u32 1, %s2570_s6   ;;  %p2572_p8 = scmp.ne.s32.totalorder %s2571_s28, 0 }
 0x65e   : > { %s1439_s10 = scalar_lea.sflag [#allocation4], %s1438_s25 }
 0x65f   : > { %p1754_p10 = pnand %p2573_p6, %p2572_p8 }
 0x661   : > { %2036 = dma.done.wait (!%p1754_p10), %s1439_s10, 128  }
 0x662   : > { %2038 = vsyncadd (!%p1754_p10), %s1439_s10, 4294967168  ;;  %s2574_s11 = smov %s2281_s13  ;;  %p27_p13 = scmp.ge.s32.totalorder %s2271_s22, 4  }
 0x663   : > { %s2575_s13 = smov %s2045_s14  ;;  %s2576_s14 = smov %s2049_s15 }
 0x664   : > { %s2577_s15 = smov %s2574_s11  ;;  %s2578_s16 = smov %s2271_s22 }
 0x665   :  { %29 = sbr.rel (!%p27_p13) target bundleno = 14 (0xe), region = 133 }
 0x66c   :  { %1444 = vsyncpa [#allocation3], 1 }
 0x66d   :  { %1446 = vsyncpa [#allocation3 + $0x1], 1 }
 0x66e   :  { %1447 = vsyncpa [#allocation6], 1 }
 0x66f   :  { %1449 = vsyncpa [#allocation6 + $0x1], 1 }
 0x670   :  { %1450 = vsyncpa [#allocation9], 1 }
 0x671   :  { %1451 = vsyncpa [#allocation4], 1 }
 0x672   :  { %1453 = vsyncpa [#allocation4 + $0x1], 1 }

</bundles_post_ra>
